<compile_context>
chip_gen: v7x
topology: tpu7x:2x2x1
jax: 0.10.0
libtpu: 0.0.40
codegen_flags: <defaults>
</compile_context>

<pallas_src>
import jax
import jax.numpy as jnp
from jax.experimental import pallas as pl
from jax.experimental.pallas import tpu as pltpu

HIDDEN_SIZES = [64, 32, 16]
BN_EPS = 1e-5
LEAKY_SLOPE = 0.1
DEFAULT_TILE_B = 2048  # rows per grid step; ~0.5 MiB double-buffered at f32


def _leaky_relu(h):
    return jnp.where(h > 0, h, LEAKY_SLOPE * h)


def _round_up(x, m):
    return ((x + m - 1) // m) * m


def mlp_kernel(
    x_ref,
    w1_ref, b1_ref,
    w2_ref, b2_ref,
    w3_ref, b3_ref,
    w4_ref, b4_ref,   # w4 stored as a (1, 16) row -> head runs on VPU/XLU
    o_ref,
):
    """Fused 4-layer MLP forward on one (TILE_B, in_features) batch tile."""
    # Block 1: (BN-folded) Linear -> LeakyReLU.  Dots accumulate in f32 on MXU.
    h = jnp.dot(x_ref[...], w1_ref[...], preferred_element_type=jnp.float32)
    h = _leaky_relu(h + b1_ref[...])

    # Block 2
    h = jnp.dot(h.astype(w2_ref.dtype), w2_ref[...],
                preferred_element_type=jnp.float32)
    h = _leaky_relu(h + b2_ref[...])

    # Block 3
    h = jnp.dot(h.astype(w3_ref.dtype), w3_ref[...],
                preferred_element_type=jnp.float32)
    h = _leaky_relu(h + b3_ref[...])

    # Output head (16 -> 1): broadcast-multiply + lane reduction (VPU/XLU),
    # keeps the near-empty (TILE_B,16)x(16,1) matmul off the MXU.
    logits = jnp.sum(h * w4_ref[...].astype(jnp.float32),
                     axis=-1, keepdims=True) + b4_ref[...]

    # Sigmoid: exp on EUP, reciprocal on EUP (approx) -> VALU slot stays free.
    o_ref[...] = pl.reciprocal(1.0 + jnp.exp(-logits),
                               approx=True).astype(o_ref.dtype)


def _resident_spec(p):
    """Whole-array block, constant block index -> stays in VMEM across steps."""
    return pl.BlockSpec(p.shape, lambda i: (0,) * p.ndim)


def chunk_size_predictor_forward(x, params, *, tile_b=DEFAULT_TILE_B):
    """x: (batch, input_size); params: folded kernel params (see fold_params)."""
    batch, in_features = x.shape

    # Tile size: multiple of 8 (sublane), capped at tile_b; pad batch to a
    # multiple of the tile so the grid divides evenly (padding sliced off).
    tb = min(tile_b, _round_up(batch, 8))
    padded = _round_up(batch, tb)
    if padded != batch:
        x = jnp.pad(x, ((0, padded - batch), (0, 0)))

    grid = (padded // tb,)
    in_specs = [pl.BlockSpec((tb, in_features), lambda i: (i, 0))]
    in_specs += [_resident_spec(p) for p in params]
    out_spec = pl.BlockSpec((tb, 1), lambda i: (i, 0))

    out = pl.pallas_call(
        mlp_kernel,
        out_shape=jax.ShapeDtypeStruct((padded, 1), jnp.float32),
        grid=grid,
        in_specs=in_specs,
        out_specs=out_spec,
        compiler_params=pltpu.CompilerParams(
            # Batch tiles are independent -> megacore-shardable on v7x.
            dimension_semantics=("parallel",),
        ),
    )(x, *params)

    return out[:batch]


def init_raw_params(key, input_size):
    """Raw PyTorch-equivalent params: Xavier-normal Linear weights, zero bias,
    freshly-initialized eval-mode BatchNorm (gamma=1, beta=0, mean=0, var=1)."""
    dims = [input_size] + HIDDEN_SIZES + [1]
    keys = jax.random.split(key, len(dims) - 1)
    hidden = []
    for li, (fan_in, fan_out) in enumerate(zip(dims[:-1], dims[1:])):
        std = jnp.sqrt(2.0 / (fan_in + fan_out))
        w = std * jax.random.normal(keys[li], (fan_in, fan_out), jnp.float32)
        b = jnp.zeros((1, fan_out), jnp.float32)
        if li < len(HIDDEN_SIZES):
            gamma = jnp.ones((1, fan_out), jnp.float32)
            beta = jnp.zeros((1, fan_out), jnp.float32)
            mean = jnp.zeros((1, fan_out), jnp.float32)
            var = jnp.ones((1, fan_out), jnp.float32)
            hidden.append((w, b, gamma, beta, mean, var))
        else:
            head = (w, b)
    return {"hidden": hidden, "head": head}


def fold_params(raw, weight_dtype=jnp.float32):
    """Fold eval-mode BatchNorm into the preceding Linear:
         w' = w * scale,  b' = b * scale + shift,
       scale = gamma/sqrt(var+eps), shift = beta - mean*scale.
    Weights may be cast to bf16 (halves HBM bytes); biases stay f32."""
    params = []
    for (w, b, gamma, beta, mean, var) in raw["hidden"]:
        scale = gamma / jnp.sqrt(var + BN_EPS)   # (1, out)
        shift = beta - mean * scale
        params.append((w * scale).astype(weight_dtype))
        params.append((b * scale + shift).astype(jnp.float32))
    w4, b4 = raw["head"]                         # w4: (16, 1), b4: (1, 1)
    params.append(jnp.reshape(w4, (1, HIDDEN_SIZES[-1])).astype(weight_dtype))
    params.append(b4.astype(jnp.float32))
    return params


def reference_forward(x, raw):
    """Pure-JAX eval-mode reference of the PyTorch module (Dropout = identity)."""
    h = x
    for (w, b, gamma, beta, mean, var) in raw["hidden"]:
        h = h @ w + b
        h = (h - mean) / jnp.sqrt(var + BN_EPS) * gamma + beta
        h = _leaky_relu(h)
    w4, b4 = raw["head"]
    logits = h @ w4 + b4
    return 1.0 / (1.0 + jnp.exp(-logits))


if __name__ == "__main__":
    # TODO(synk): training-mode Dropout / batch-statistics BatchNorm not
    # implemented (this kernel is the eval-mode forward, as in module.eval()).
    key = jax.random.PRNGKey(0)
    k_x, k_p = jax.random.split(key)

    batch, input_size = 8, 32
    x = jax.random.normal(k_x, (batch, input_size), dtype=jnp.float32)
    raw = init_raw_params(k_p, input_size)
    ref = reference_forward(x, raw)

    # f32 path (tolerance relaxed slightly for the approx EUP reciprocal).
    params_f32 = fold_params(raw, jnp.float32)
    out_f32 = jax.block_until_ready(chunk_size_predictor_forward(x, params_f32))
    assert out_f32.shape == (batch, 1)
    assert jnp.allclose(out_f32, ref, atol=5e-3, rtol=5e-3)

    # bf16-streaming path: x and weights in bf16, f32 accumulation/elementwise.
    params_bf16 = fold_params(raw, jnp.bfloat16)
    out_bf16 = jax.block_until_ready(
        chunk_size_predictor_forward(x.astype(jnp.bfloat16), params_bf16)
    )
    assert out_bf16.shape == (batch, 1)
    assert jnp.allclose(out_bf16, ref, atol=3e-2, rtol=3e-2)

    print("KERNEL_OK")
</pallas_src>

<mosaic_0001>
module attributes {stable_mosaic.version = 11 : i64} {
  func.func @mlp_kernel(%arg0: i32, %arg1: memref<8x32xf32, #tpu.memory_space<vmem>>, %arg2: memref<32x64xf32, #tpu.memory_space<vmem>>, %arg3: memref<1x64xf32, #tpu.memory_space<vmem>>, %arg4: memref<64x32xf32, #tpu.memory_space<vmem>>, %arg5: memref<1x32xf32, #tpu.memory_space<vmem>>, %arg6: memref<32x16xf32, #tpu.memory_space<vmem>>, %arg7: memref<1x16xf32, #tpu.memory_space<vmem>>, %arg8: memref<1x16xf32, #tpu.memory_space<vmem>>, %arg9: memref<1x1xf32, #tpu.memory_space<vmem>>, %arg10: memref<8x1xf32, #tpu.memory_space<vmem>>) attributes {dimension_semantics = [#tpu.dimension_semantics<parallel>], iteration_bounds = array<i64: 1>, scalar_prefetch = 0 : i64, scratch_operands = 0 : i64, tpu.core_type = #tpu.core_type<tc>, window_params = [{transform_indices = @transform_0, window_bounds = array<i64: 8, 32>}, {pipeline_mode = #tpu.pipeline_mode<synchronous>, transform_indices = @transform_1, window_bounds = array<i64: 32, 64>}, {pipeline_mode = #tpu.pipeline_mode<synchronous>, transform_indices = @transform_2, window_bounds = array<i64: 1, 64>}, {pipeline_mode = #tpu.pipeline_mode<synchronous>, transform_indices = @transform_3, window_bounds = array<i64: 64, 32>}, {pipeline_mode = #tpu.pipeline_mode<synchronous>, transform_indices = @transform_4, window_bounds = array<i64: 1, 32>}, {pipeline_mode = #tpu.pipeline_mode<synchronous>, transform_indices = @transform_5, window_bounds = array<i64: 32, 16>}, {pipeline_mode = #tpu.pipeline_mode<synchronous>, transform_indices = @transform_6, window_bounds = array<i64: 1, 16>}, {pipeline_mode = #tpu.pipeline_mode<synchronous>, transform_indices = @transform_7, window_bounds = array<i64: 1, 16>}, {pipeline_mode = #tpu.pipeline_mode<synchronous>, transform_indices = @transform_8, window_bounds = array<i64: 1, 1>}, {transform_indices = @transform_9, window_bounds = array<i64: 8, 1>}]} {
    %c0 = arith.constant 0 : index
    %c0_0 = arith.constant 0 : index
    %0 = vector.load %arg1[%c0, %c0_0] : memref<8x32xf32, #tpu.memory_space<vmem>>, vector<8x32xf32>
    %c0_1 = arith.constant 0 : index
    %c0_2 = arith.constant 0 : index
    %1 = vector.load %arg2[%c0_1, %c0_2] : memref<32x64xf32, #tpu.memory_space<vmem>>, vector<32x64xf32>
    %cst = arith.constant dense<0.000000e+00> : vector<8x64xf32>
    %2 = tpu.matmul %0, %1, %cst {dimension_numbers = #tpu.dot_dimension_numbers<[1], [0], [0], [1], [0, 0, 1, 1], [], []>} : vector<8x32xf32>, vector<32x64xf32>, vector<8x64xf32> -> vector<8x64xf32>
    %c0_3 = arith.constant 0 : index
    %c0_4 = arith.constant 0 : index
    %3 = vector.load %arg3[%c0_3, %c0_4] : memref<1x64xf32, #tpu.memory_space<vmem>>, vector<1x64xf32>
    %4 = vector.broadcast %3 : vector<1x64xf32> to vector<8x64xf32>
    %5 = arith.addf %2, %4 : vector<8x64xf32>
    %cst_5 = arith.constant 0.000000e+00 : f32
    %6 = vector.broadcast %cst_5 : f32 to vector<8x64xf32>
    %7 = arith.cmpf ogt, %5, %6 : vector<8x64xf32>
    %cst_6 = arith.constant 1.000000e-01 : f32
    %8 = vector.broadcast %cst_6 : f32 to vector<8x64xf32>
    %9 = arith.mulf %8, %5 : vector<8x64xf32>
    %10 = arith.select %7, %5, %9 : vector<8x64xi1>, vector<8x64xf32>
    %c0_7 = arith.constant 0 : index
    %c0_8 = arith.constant 0 : index
    %11 = vector.load %arg4[%c0_7, %c0_8] : memref<64x32xf32, #tpu.memory_space<vmem>>, vector<64x32xf32>
    %cst_9 = arith.constant dense<0.000000e+00> : vector<8x32xf32>
    %12 = tpu.matmul %10, %11, %cst_9 {dimension_numbers = #tpu.dot_dimension_numbers<[1], [0], [0], [1], [0, 0, 1, 1], [], []>} : vector<8x64xf32>, vector<64x32xf32>, vector<8x32xf32> -> vector<8x32xf32>
    %c0_10 = arith.constant 0 : index
    %c0_11 = arith.constant 0 : index
    %13 = vector.load %arg5[%c0_10, %c0_11] : memref<1x32xf32, #tpu.memory_space<vmem>>, vector<1x32xf32>
    %14 = vector.broadcast %13 : vector<1x32xf32> to vector<8x32xf32>
    %15 = arith.addf %12, %14 : vector<8x32xf32>
    %cst_12 = arith.constant 0.000000e+00 : f32
    %16 = vector.broadcast %cst_12 : f32 to vector<8x32xf32>
    %17 = arith.cmpf ogt, %15, %16 : vector<8x32xf32>
    %cst_13 = arith.constant 1.000000e-01 : f32
    %18 = vector.broadcast %cst_13 : f32 to vector<8x32xf32>
    %19 = arith.mulf %18, %15 : vector<8x32xf32>
    %20 = arith.select %17, %15, %19 : vector<8x32xi1>, vector<8x32xf32>
    %c0_14 = arith.constant 0 : index
    %c0_15 = arith.constant 0 : index
    %21 = vector.load %arg6[%c0_14, %c0_15] : memref<32x16xf32, #tpu.memory_space<vmem>>, vector<32x16xf32>
    %cst_16 = arith.constant dense<0.000000e+00> : vector<8x16xf32>
    %22 = tpu.matmul %20, %21, %cst_16 {dimension_numbers = #tpu.dot_dimension_numbers<[1], [0], [0], [1], [0, 0, 1, 1], [], []>} : vector<8x32xf32>, vector<32x16xf32>, vector<8x16xf32> -> vector<8x16xf32>
    %c0_17 = arith.constant 0 : index
    %c0_18 = arith.constant 0 : index
    %23 = vector.load %arg7[%c0_17, %c0_18] : memref<1x16xf32, #tpu.memory_space<vmem>>, vector<1x16xf32>
    %24 = vector.broadcast %23 : vector<1x16xf32> to vector<8x16xf32>
    %25 = arith.addf %22, %24 : vector<8x16xf32>
    %cst_19 = arith.constant 0.000000e+00 : f32
    %26 = vector.broadcast %cst_19 : f32 to vector<8x16xf32>
    %27 = arith.cmpf ogt, %25, %26 : vector<8x16xf32>
    %cst_20 = arith.constant 1.000000e-01 : f32
    %28 = vector.broadcast %cst_20 : f32 to vector<8x16xf32>
    %29 = arith.mulf %28, %25 : vector<8x16xf32>
    %30 = arith.select %27, %25, %29 : vector<8x16xi1>, vector<8x16xf32>
    %c0_21 = arith.constant 0 : index
    %c0_22 = arith.constant 0 : index
    %31 = vector.load %arg8[%c0_21, %c0_22] : memref<1x16xf32, #tpu.memory_space<vmem>>, vector<1x16xf32>
    %32 = vector.broadcast %31 : vector<1x16xf32> to vector<8x16xf32>
    %33 = arith.mulf %30, %32 : vector<8x16xf32>
    %cst_23 = arith.constant dense<0.000000e+00> : vector<8xf32>
    %34 = vector.multi_reduction <add>, %33, %cst_23 [1] : vector<8x16xf32> to vector<8xf32>
    %35 = vector.shape_cast %34 : vector<8xf32> to vector<8x1xf32>
    %c0_24 = arith.constant 0 : index
    %c0_25 = arith.constant 0 : index
    %36 = vector.load %arg9[%c0_24, %c0_25] : memref<1x1xf32, #tpu.memory_space<vmem>>, vector<1x1xf32>
    %37 = vector.broadcast %36 : vector<1x1xf32> to vector<8x1xf32>
    %38 = arith.addf %35, %37 : vector<8x1xf32>
    %cst_26 = arith.constant 0.000000e+00 : f32
    %39 = vector.broadcast %cst_26 : f32 to vector<8x1xf32>
    %40 = arith.subf %39, %38 : vector<8x1xf32>
    %41 = math.exp %40 : vector<8x1xf32>
    %cst_27 = arith.constant 1.000000e+00 : f32
    %42 = vector.broadcast %cst_27 : f32 to vector<8x1xf32>
    %43 = arith.addf %42, %41 : vector<8x1xf32>
    %44 = tpu.reciprocal %43 {approx = true} : vector<8x1xf32> -> vector<8x1xf32>
    %c0_28 = arith.constant 0 : index
    %c0_29 = arith.constant 0 : index
    %45 = vector.load %arg10[%c0_28, %c0_29] : memref<8x1xf32, #tpu.memory_space<vmem>>, vector<8x1xf32>
    tpu.vector_store %arg10[%c0_28, %c0_29], %44 {strides = array<i32>} : memref<8x1xf32, #tpu.memory_space<vmem>>, vector<8x1xf32>,
    return
  }
  func.func @transform_0(%arg0: i32) -> (i32, i32) {
    %c0_i32 = arith.constant 0 : i32
    %c0_i32_0 = arith.constant 0 : i32
    return %arg0, %c0_i32 : i32, i32
  }
  func.func @transform_1(%arg0: i32) -> (i32, i32) {
    %c0_i32 = arith.constant 0 : i32
    %c0_i32_0 = arith.constant 0 : i32
    %c0_i32_1 = arith.constant 0 : i32
    return %c0_i32, %c0_i32_0 : i32, i32
  }
  func.func @transform_2(%arg0: i32) -> (i32, i32) {
    %c0_i32 = arith.constant 0 : i32
    %c0_i32_0 = arith.constant 0 : i32
    %c0_i32_1 = arith.constant 0 : i32
    return %c0_i32, %c0_i32_0 : i32, i32
  }
  func.func @transform_3(%arg0: i32) -> (i32, i32) {
    %c0_i32 = arith.constant 0 : i32
    %c0_i32_0 = arith.constant 0 : i32
    %c0_i32_1 = arith.constant 0 : i32
    return %c0_i32, %c0_i32_0 : i32, i32
  }
  func.func @transform_4(%arg0: i32) -> (i32, i32) {
    %c0_i32 = arith.constant 0 : i32
    %c0_i32_0 = arith.constant 0 : i32
    %c0_i32_1 = arith.constant 0 : i32
    return %c0_i32, %c0_i32_0 : i32, i32
  }
  func.func @transform_5(%arg0: i32) -> (i32, i32) {
    %c0_i32 = arith.constant 0 : i32
    %c0_i32_0 = arith.constant 0 : i32
    %c0_i32_1 = arith.constant 0 : i32
    return %c0_i32, %c0_i32_0 : i32, i32
  }
  func.func @transform_6(%arg0: i32) -> (i32, i32) {
    %c0_i32 = arith.constant 0 : i32
    %c0_i32_0 = arith.constant 0 : i32
    %c0_i32_1 = arith.constant 0 : i32
    return %c0_i32, %c0_i32_0 : i32, i32
  }
  func.func @transform_7(%arg0: i32) -> (i32, i32) {
    %c0_i32 = arith.constant 0 : i32
    %c0_i32_0 = arith.constant 0 : i32
    %c0_i32_1 = arith.constant 0 : i32
    return %c0_i32, %c0_i32_0 : i32, i32
  }
  func.func @transform_8(%arg0: i32) -> (i32, i32) {
    %c0_i32 = arith.constant 0 : i32
    %c0_i32_0 = arith.constant 0 : i32
    %c0_i32_1 = arith.constant 0 : i32
    return %c0_i32, %c0_i32_0 : i32, i32
  }
  func.func @transform_9(%arg0: i32) -> (i32, i32) {
    %c0_i32 = arith.constant 0 : i32
    %c0_i32_0 = arith.constant 0 : i32
    return %arg0, %c0_i32 : i32, i32
  }
}

</mosaic_0001>

<bundles_post_ra>
// kernel: tpu_custom_call.1
= control target key start
LH: loop header
LB: loop body
LE: loop exit
PB: predicated region body
PF: predicated region fallthrough
CT: control target
= control target key end

     0   :  { %v432_v0 = vmov 0.0|0.0   ;;  %vm433_vm0 = vmmov 0   ;;  %v434_v4 = vmov 0.0   ;;  %vm46_vm1 = vcmask 261120   ;;  %s559_s1 = inlined_call_operand.vmem [shape: f32[32,64], index: 1, kind: input, shape index: {}]   ;;  %s560_s3 = inlined_call_operand.vmem [shape: f32[64,32], index: 3, kind: input, shape index: {}]   ;;  %s561_s0 = inlined_call_operand.vmem [shape: f32[8,32], index: 0, kind: input, shape index: {}]   ;;  %s562_s5 = inlined_call_operand.vmem [shape: f32[32,16], index: 5, kind: input, shape index: {}]   ;;  %s563_s2 = inlined_call_operand.vmem [shape: f32[1,64], index: 2, kind: input, shape index: {}]   ;;  %s564_s4 = inlined_call_operand.vmem [shape: f32[1,32], index: 4, kind: input, shape index: {}]   ;;  %s565_s8 = inlined_call_operand.<no memory space> [shape: f32[1,1], index: 8, kind: input, shape index: {}]   ;;  %s566_s6 = inlined_call_operand.vmem [shape: f32[1,16], index: 6, kind: input, shape index: {}]   ;;  %s567_s7 = inlined_call_operand.vmem [shape: f32[1,16], index: 7, kind: input, shape index: {}]   ;;  %s568_s9 = inlined_call_operand.vmem [shape: f32[8,1], index: 9, kind: output, shape index: {}]  }
   0x1   :  { %401 = vmatprep.subr.bf16.mxu0 %v432_v0  ;;  %v35_v1 = vld [vmem:[%s559_s1] sm:$0xff]  ;;  %v36_v2 = vld [vmem:[%s559_s1 + $0x8] sm:$0xff]  ;;  %v37_v3 = vld [vmem:[%s559_s1 + $0x10] sm:$0xff]  ;;  %368 = vmatprep.mubr.msk.f32.mxu0 %vm433_vm0, %v434_v4  ;;  %vm138_vm3 = vcmask 523264   ;;  %v14_v39 = vstv %s565_s8  ;;  %vm310_vm6 = vcmask 130048   ;;  %vm327_vm7 = vcmask 7168  }
   0x2   :  { %v402_v5 = vpack.c.bf16 %v36_v2, %v35_v1  ;;  %v38_v6 = vld [vmem:[%s559_s1 + $0x18] sm:$0xff]  ;;  %407 = vmatprep.subr.bf16.mxu1 %v432_v0  ;;  %v123_v7 = vld [vmem:[%s560_s3] sm:$0xff]  ;;  %387 = vmatprep.mubr.msk.f32.mxu1 %vm433_vm0, %v434_v4  ;;  %v124_v8 = vld [vmem:[%s560_s3 + $0x8] sm:$0xff]  ;;  %15 = vst [vmem:[#allocation2] sm:$0x1] %v14_v39 }
   0x3   :  { %v125_v9 = vld [vmem:[%s560_s3 + $0x10] sm:$0xff]  ;;  %v126_v10 = vld [vmem:[%s560_s3 + $0x18] sm:$0xff]  ;;  %v405_v11 = vpack.c.bf16 %v38_v6, %v37_v3  ;;  %v408_v12 = vpack.c.bf16 %v124_v8, %v123_v7  ;;  %v127_v14 = vld [vmem:[%s560_s3 + $0x20] sm:$0xff] }
   0x4   :  { %403 = vmatpush3.bf16.msra.mxu0 %v402_v5  ;;  %v411_v13 = vpack.c.bf16 %v126_v10, %v125_v9  ;;  %v128_v15 = vld [vmem:[%s560_s3 + $0x28] sm:$0xff]  ;;  %v34_v16 = vld [vmem:[%s561_s0] sm:$0xff]  ;;  %v129_v18 = vld [vmem:[%s560_s3 + $0x30] sm:$0xff] }
   0x5   :  { %404 = vmatprep.subr.bf16.mxu0 %v432_v0  ;;  %409 = vmatpush3.bf16.msra.mxu1 %v408_v12  ;;  %v414_v17 = vpack.c.bf16 %v128_v15, %v127_v14  ;;  %v130_v19 = vld [vmem:[%s560_s3 + $0x38] sm:$0xff]  ;;  %v215_v21 = vld [vmem:[%s562_s5] sm:$0xff]  ;;  %v216_v22 = vld [vmem:[%s562_s5 + $0x8] sm:$0xff] }
   0x6   :  { %410 = vmatprep.subr.bf16.mxu1 %v432_v0  ;;  %v417_v20 = vpack.c.bf16 %v130_v19, %v129_v18  ;;  %v420_v23 = vpack.c.bf16 %v216_v22, %v215_v21  ;;  %v333_v24 = vld [vmem:[%s563_s2] ss:$0 sm:$0xff]  ;;  %v217_v30 = vld [vmem:[%s562_s5 + $0x10] sm:$0xff]  ;;  %v218_v31 = vld [vmem:[%s562_s5 + $0x18] sm:$0xff] }
   0x7   :  { %v423_v32 = vpack.c.bf16 %v218_v31, %v217_v30  ;;  %v335_v33 = vld [vmem:[%s564_s4] ss:$0 sm:$0xff] }
   0x8   :  { %406 = vmatpush3.bf16.msra.mxu0 %v405_v11  ;;  %v337_v40 = vld [vmem:[%s566_s6] ss:$0 sm:$0xff] }
   0x9   :  { %419 = vmatprep.subr.bf16.mxu0 %v432_v0  ;;  %412 = vmatpush3.bf16.msra.mxu1 %v411_v13  ;;  %v339_v45 = vld [vmem:[%s567_s7] ss:$0 sm:$0xff] }
   0xa   :  { %413 = vmatprep.subr.bf16.mxu1 %v432_v0  ;;  %v340_v49 = vld [vmem:[#allocation2] ss:$0 sm:$0xff] }
   0xb   :  { %369 = vmatmul.mubr.msk.f32.vlgmr.msra.gmra.mrb[0].mxu0 %vm46_vm1, %v34_v16 }
   0xc   :  { %398 = vmatprep.mubr.msk.f32.mxu0 %vm433_vm0, %v434_v4  ;;  %421 = vmatpush3.bf16.msra.mxu0 %v420_v23 }
   0xd   :  { %415 = vmatpush3.bf16.msra.mxu1 %v414_v17  ;;  %422 = vmatprep.subr.bf16.mxu0 %v432_v0 }
   0xe   :  { %416 = vmatprep.subr.bf16.mxu1 %v432_v0 }
  0x10   :  { %424 = vmatpush3.bf16.msra.mxu0 %v423_v32 }
  0x11   :  { %418 = vmatpush3.bf16.msra.mxu1 %v417_v20 }
  0xde   :  { %v116_v25 = vpop.f32.mrb[0].mxu0 }
  0xdf   :  { %v117_v26 = vadd.f32 %v333_v24, %v116_v25  ;;  %v370_v27 = vpop.f32.mrb[1].mxu0 }
  0xe1   :  { %vm120_vm2 = vcmp.gt.f32.partialorder %v117_v26, 0.0  ;;  %v121_v28 = vmul.f32 0.1, %v117_v26 }
  0xe3   :  { %v122_v29 = vsel %vm120_vm2, %v117_v26, %v121_v28 }
  0xe4   :  { %388 = vmatmul.mubr.msk.f32.vlgmr.msra.gmra.mrb[0].mxu1 %vm138_vm3, %v122_v29 }
 0x1b7   :  { %v208_v34 = vpop.f32.mrb[0].mxu1 }
 0x1b8   :  { %v209_v35 = vadd.f32 %v335_v33, %v208_v34  ;;  %v389_v36 = vpop.f32.mrb[1].mxu1 }
 0x1ba   :  { %vm212_vm4 = vcmp.gt.f32.partialorder %v209_v35, 0.0  ;;  %v213_v37 = vmul.f32 0.1, %v209_v35 }
 0x1bc   :  { %v214_v38 = vsel %vm212_vm4, %v209_v35, %v213_v37 }
 0x1bd   :  { %399 = vmatmul.mubr.msk.f32.vlgmr.msra.gmra.mrb[2].mxu0 %vm46_vm1, %v214_v38 }
 0x290   :  { %v295_v41 = vpop.f32.mrb[2].mxu0 }
 0x291   :  { %v296_v42 = vadd.f32 %v337_v40, %v295_v41  ;;  %v400_v43 = vpop.f32.mrb[3].mxu0 }
 0x293   :  { %v300_v44 = vmul.f32 0.1, %v296_v42  ;;  %vm299_vm5 = vcmp.gt.f32.partialorder %v296_v42, 0.0 }
 0x295   :  { %v301_v46 = vsel %vm299_vm5, %v296_v42, %v300_v44 }
 0x296   :  { %v309_v47 = vmul.f32 %v339_v45, %v301_v46 }
 0x298   :  { %v311_v48 = vsel %vm310_vm6, %v309_v47, 0.0 }
 0x299   :  { %312 = vadd.xlane.f32.xlu0 %v311_v48 }
 0x326   :  { %v313_v50 = vpop.xlane.xlu0 %312 }
 0x327   :  { %v321_v51 = vadd.f32 %v340_v49, %v313_v50 }
 0x329   :  { %v322_v52 = vsub.f32 0.0, %v321_v51 }
 0x32b   :  { %v323_v53 = vmul.f32 1.442695, %v322_v52 }
 0x32d   :  { %428 = vpow2.f32 %v323_v53 }
 0x337   :  { %v429_v54 = vpop.eup %428 }
 0x338   :  { %v325_v55 = vadd.f32 1.0, %v429_v54 }
 0x33a   :  { %430 = vrcp.f32 %v325_v55 }
 0x344   :  { %v431_v56 = vpop.eup %430 }
 0x345   :  { %328 = vst.msk [vmem:[%s568_s9] sm:$0xff] %vm327_vm7, %v431_v56 }

</bundles_post_ra>
